<compile_context>
chip_gen: v5e
topology: v5e:2x2
jax: 0.10.0
libtpu: 0.0.40
codegen_flags: <defaults>
</compile_context>

<pallas_src>
import functools

import jax
import jax.numpy as jnp
from jax.experimental import pallas as pl
from jax.experimental.pallas import tpu as pltpu


def _round_up(v, m):
    return (v + m - 1) // m * m


def _vmem_capacity_bytes():
    try:
        info = pltpu.get_tpu_info()
        cap = getattr(info, "vmem_capacity_bytes", None)
        if cap:
            return int(cap)
    except Exception:
        pass
    return 64 * 1024 * 1024  # conservative default (v7x-sized)


def _embed_norm_kernel(x_ref, p_ref, o_ref, *, true_len, eps):
    # x_ref / o_ref: (row_tile, L);  p_ref: (row_tile, 2) f32 -> [scale+1, bias]
    x = x_ref[...].astype(jnp.float32)

    inv_n = 1.0 / float(true_len)
    mean = jnp.sum(x, axis=-1, keepdims=True) * inv_n

    centered = x - mean
    # torch.std_mean defaults to the unbiased (Bessel, /(n-1)) estimator.
    # L == 1 yields NaN, mirroring torch.std(..., unbiased=True) on one sample.
    inv_nm1 = 1.0 / float(true_len - 1) if true_len > 1 else float("nan")
    var = jnp.sum(centered * centered, axis=-1, keepdims=True) * inv_nm1
    inv_std = 1.0 / (jnp.sqrt(var) + eps)  # eps added to std (not var), as in torch

    p = p_ref[...]
    alpha = p[:, 0:1] * inv_std            # scale (already +1) / (std + eps)
    beta = p[:, 1:2] - mean * alpha

    # Re-read x so the f32 upcast / `centered` temporaries are dead by now.
    o_ref[...] = (x_ref[...].astype(jnp.float32) * alpha + beta).astype(o_ref.dtype)


def embed_norm_1d(x, emb_data, conv_w, conv_b, eps=1e-5):
    """EmbedNorm1d forward.

    x:        (N, C, L)            any float dtype
    emb_data: (N, E)               embeddings['data']
    conv_w:   (2C, E, 1) | (2C, E) Conv1d(E, 2C, kernel_size=1) weight
    conv_b:   (2C,)                Conv1d bias
    returns (N, C, L), same dtype as x
    """
    N, C, L = x.shape
    E = emb_data.shape[-1]
    NC = N * C

    # --- embed_to_param_net: 1x1 Conv1d == (N, E) @ (E, 2C) + b -------------
    # TODO(synk): tiny one-off param matmul kept as a plain XLA dot (it is off
    # the memory-bound x path) rather than a fused Pallas prologue.
    w2d = conv_w.reshape(2 * C, E).astype(jnp.float32)
    params = jnp.dot(emb_data.astype(jnp.float32), w2d.T,
                     precision=jax.lax.Precision.HIGHEST) + conv_b.astype(jnp.float32)
    scale = (params[:, :C] + 1.0).reshape(NC)          # per-(n, c) scale (already +1)
    bias = params[:, C:].reshape(NC)                   # per-(n, c) bias
    sb = jnp.stack([scale, bias], axis=-1)              # (NC, 2) f32, one sliver DMA/tile

    x2d = x.reshape(NC, L)                               # no padding copy of x

    # --- tiling --------------------------------------------------------------
    itemsize = jnp.dtype(x.dtype).itemsize
    sub = {4: 8, 2: 16, 1: 32}.get(itemsize, 8)          # sublane multiple by dtype

    vmem_cap = _vmem_capacity_bytes()
    big_vmem = vmem_cap >= 128 * 1024 * 1024             # v5e / v6e
    two_tc = not big_vmem                                 # v7x heuristic: 64 MiB/TC, 2 TCs

    # Size the row tile against the f32 working set (kernel upcasts to f32).
    target_f32_block = (8 << 20) if big_vmem else (4 << 20)
    f32_row_bytes = L * 4
    rows_fit = max(sub, (target_f32_block // f32_row_bytes) // sub * sub)
    rows_fit = min(rows_fit, 4096)                        # bound per-row-stat VMEM cost

    if NC <= sub:
        row_tile = NC                                     # full-dim block (rule-exempt)
    else:
        row_tile = min(rows_fit, _round_up(NC, sub))
        if two_tc and NC >= 8 * sub:
            # v7x: aim for >= 8 grid steps so both TensorCores hit steady state.
            row_tile = min(row_tile, max(sub, _round_up(pl.cdiv(NC, 8), sub)))
    grid = (pl.cdiv(NC, row_tile),)
    # TODO(synk): for very large L (a single (sub, L) f32 block over budget),
    # switch to a two-pass sum / sum-of-squares accumulation over L tiles.

    # --- VMEM budget (f32-aware) ---------------------------------------------
    block_io_bytes = row_tile * L * itemsize              # one in/out block (x dtype)
    f32_block_bytes = row_tile * L * 4                    # f32 temporaries
    param_vmem_bytes = row_tile * 512                     # (row_tile, 2) f32, lane-padded
    stat_vmem_bytes = 8 * row_tile * 512                  # mean/var/alpha/beta/... spills
    vmem_need = (4 * block_io_bytes                       # in + out, double-buffered
                 + 3 * f32_block_bytes                    # f32 block temporaries headroom
                 + 2 * param_vmem_bytes
                 + stat_vmem_bytes
                 + (2 << 20))
    cap = (96 << 20) if big_vmem else (48 << 20)          # leave headroom on v7x's 64 MiB
    vmem_limit = int(min(max(vmem_need, 32 << 20), cap))

    kernel = functools.partial(_embed_norm_kernel, true_len=L, eps=float(eps))

    out2d = pl.pallas_call(
        kernel,
        out_shape=jax.ShapeDtypeStruct((NC, L), x.dtype),
        grid_spec=pltpu.PrefetchScalarGridSpec(
            num_scalar_prefetch=0,
            grid=grid,
            in_specs=[
                pl.BlockSpec((row_tile, L), lambda i: (i, 0)),   # full-L block, no padding
                pl.BlockSpec((row_tile, 2), lambda i: (i, 0)),   # per-tile [scale, bias]
            ],
            out_specs=pl.BlockSpec((row_tile, L), lambda i: (i, 0)),
        ),
        compiler_params=pltpu.CompilerParams(
            dimension_semantics=("parallel",),
            vmem_limit_bytes=vmem_limit,
        ),
    )(x2d, sb)

    return out2d.reshape(N, C, L)


def _embed_norm_ref(x, emb_data, conv_w, conv_b, eps=1e-5):
    N, C, L = x.shape
    xf = x.astype(jnp.float32)
    mean = jnp.mean(xf, axis=2, keepdims=True)
    std = jnp.std(xf, axis=2, keepdims=True, ddof=1)  # torch unbiased std
    w2d = conv_w.reshape(2 * C, -1).astype(jnp.float32)
    params = jnp.dot(emb_data.astype(jnp.float32), w2d.T,
                     precision=jax.lax.Precision.HIGHEST) + conv_b.astype(jnp.float32)
    scale = params[:, :C] + 1.0
    bias = params[:, C:]
    out = (xf - mean) / (std + eps)
    out = out * scale[:, :, None] + bias[:, :, None]
    return out.astype(x.dtype)


if __name__ == "__main__":
    N, C, L, E = 2, 4, 16, 8
    scale_std = 0.1

    key = jax.random.PRNGKey(0)
    kx, ke, kw = jax.random.split(key, 3)
    x = jax.random.normal(kx, (N, C, L), dtype=jnp.float32)
    emb_data = jax.random.normal(ke, (N, E), dtype=jnp.float32)
    # Conv1d(E, 2C, kernel_size=1): weight rescaled by scale_std / 0.6, bias zeroed
    conv_w = jax.random.normal(kw, (2 * C, E, 1), dtype=jnp.float32) * (scale_std / 0.6)
    conv_b = jnp.zeros((2 * C,), dtype=jnp.float32)

    out = jax.block_until_ready(embed_norm_1d(x, emb_data, conv_w, conv_b))
    ref = jax.block_until_ready(_embed_norm_ref(x, emb_data, conv_w, conv_b))

    assert out.shape == (N, C, L)
    assert out.dtype == x.dtype
    assert jnp.allclose(out, ref, atol=1e-5, rtol=1e-5), "mismatch vs reference"

    print("KERNEL_OK")
</pallas_src>

<mosaic_0001>
module attributes {stable_mosaic.version = 11 : i64} {
  func.func @_embed_norm_kernel(%arg0: i32, %arg1: memref<8x16xf32, #tpu.memory_space<vmem>>, %arg2: memref<8x2xf32, #tpu.memory_space<vmem>>, %arg3: memref<8x16xf32, #tpu.memory_space<vmem>>) attributes {dimension_semantics = [#tpu.dimension_semantics<parallel>], iteration_bounds = array<i64: 1>, scalar_prefetch = 0 : i64, scratch_operands = 0 : i64, tpu.core_type = #tpu.core_type<tc>, window_params = [{transform_indices = @transform_0, window_bounds = array<i64: 8, 16>}, {transform_indices = @transform_1, window_bounds = array<i64: 8, 2>}, {transform_indices = @transform_2, window_bounds = array<i64: 8, 16>}]} {
    %c0 = arith.constant 0 : index
    %c0_0 = arith.constant 0 : index
    %0 = vector.load %arg1[%c0, %c0_0] : memref<8x16xf32, #tpu.memory_space<vmem>>, vector<8x16xf32>
    %cst = arith.constant dense<0.000000e+00> : vector<8xf32>
    %1 = vector.multi_reduction <add>, %0, %cst [1] : vector<8x16xf32> to vector<8xf32>
    %2 = vector.shape_cast %1 : vector<8xf32> to vector<8x1xf32>
    %cst_1 = arith.constant 6.250000e-02 : f32
    %3 = vector.broadcast %cst_1 : f32 to vector<8x1xf32>
    %4 = arith.mulf %2, %3 : vector<8x1xf32>
    %5 = vector.broadcast %4 : vector<8x1xf32> to vector<8x16xf32>
    %6 = arith.subf %0, %5 : vector<8x16xf32>
    %7 = arith.mulf %6, %6 : vector<8x16xf32>
    %cst_2 = arith.constant dense<0.000000e+00> : vector<8xf32>
    %8 = vector.multi_reduction <add>, %7, %cst_2 [1] : vector<8x16xf32> to vector<8xf32>
    %9 = vector.shape_cast %8 : vector<8xf32> to vector<8x1xf32>
    %cst_3 = arith.constant 0.0666666701 : f32
    %10 = vector.broadcast %cst_3 : f32 to vector<8x1xf32>
    %11 = arith.mulf %9, %10 : vector<8x1xf32>
    %12 = math.sqrt %11 : vector<8x1xf32>
    %cst_4 = arith.constant 9.99999974E-6 : f32
    %13 = vector.broadcast %cst_4 : f32 to vector<8x1xf32>
    %14 = arith.addf %12, %13 : vector<8x1xf32>
    %cst_5 = arith.constant 1.000000e+00 : f32
    %15 = vector.broadcast %cst_5 : f32 to vector<8x1xf32>
    %16 = arith.divf %15, %14 : vector<8x1xf32>
    %c0_6 = arith.constant 0 : index
    %c0_7 = arith.constant 0 : index
    %17 = vector.load %arg2[%c0_6, %c0_7] : memref<8x2xf32, #tpu.memory_space<vmem>>, vector<8x2xf32>
    %18 = vector.extract_strided_slice %17 {offsets = [0, 0], sizes = [8, 1], strides = [1, 1]} : vector<8x2xf32> to vector<8x1xf32>
    %19 = arith.mulf %18, %16 : vector<8x1xf32>
    %20 = vector.extract_strided_slice %17 {offsets = [0, 1], sizes = [8, 1], strides = [1, 1]} : vector<8x2xf32> to vector<8x1xf32>
    %21 = arith.mulf %4, %19 : vector<8x1xf32>
    %22 = arith.subf %20, %21 : vector<8x1xf32>
    %c0_8 = arith.constant 0 : index
    %c0_9 = arith.constant 0 : index
    %23 = vector.load %arg1[%c0_8, %c0_9] : memref<8x16xf32, #tpu.memory_space<vmem>>, vector<8x16xf32>
    %24 = vector.broadcast %19 : vector<8x1xf32> to vector<8x16xf32>
    %25 = arith.mulf %23, %24 : vector<8x16xf32>
    %26 = vector.broadcast %22 : vector<8x1xf32> to vector<8x16xf32>
    %27 = arith.addf %25, %26 : vector<8x16xf32>
    %c0_10 = arith.constant 0 : index
    %c0_11 = arith.constant 0 : index
    %28 = vector.load %arg3[%c0_10, %c0_11] : memref<8x16xf32, #tpu.memory_space<vmem>>, vector<8x16xf32>
    tpu.vector_store %arg3[%c0_10, %c0_11], %27 {strides = array<i32>} : memref<8x16xf32, #tpu.memory_space<vmem>>, vector<8x16xf32>,
    return
  }
  func.func @transform_0(%arg0: i32) -> (i32, i32) {
    %c0_i32 = arith.constant 0 : i32
    %c0_i32_0 = arith.constant 0 : i32
    return %arg0, %c0_i32 : i32, i32
  }
  func.func @transform_1(%arg0: i32) -> (i32, i32) {
    %c0_i32 = arith.constant 0 : i32
    %c0_i32_0 = arith.constant 0 : i32
    return %arg0, %c0_i32 : i32, i32
  }
  func.func @transform_2(%arg0: i32) -> (i32, i32) {
    %c0_i32 = arith.constant 0 : i32
    %c0_i32_0 = arith.constant 0 : i32
    return %arg0, %c0_i32 : i32, i32
  }
}

</mosaic_0001>

<bundles_post_ra>
// kernel: tpu_custom_call.1
= control target key start
LH: loop header
LB: loop body
LE: loop exit
PB: predicated region body
PF: predicated region fallthrough
CT: control target
= control target key end

     0   :  { %vm13_vm0 = vcmask 130048   ;;  %s157_s0 = inlined_call_operand.vmem [shape: f32[8,16], index: 0, kind: input, shape index: {}]   ;;  %s158_s1 = inlined_call_operand.vmem [shape: f32[8,2], index: 1, kind: input, shape index: {}]   ;;  %s159_s2 = inlined_call_operand.hbm [shape: f32[8,16], index: 2, kind: output, shape index: {}]  }
   0x1   :  { %v12_v0 = vld [vmem:[%s157_s0] sm:$0xff] }
   0x2   :  { %7 = vsyncpa [#allocation3], 0  ;;  %v14_v1 = vsel %vm13_vm0, %v12_v0, 0.0  ;;  %v126_v14 = vmov 0   ;;  %v52_v29 = vld [vmem:[%s158_s1] sm:$0xff]  ;;  %s127_s12 = smov 1  }
   0x3   :  { %15 = vadd.xlane.f32.xlu0 %v14_v1  ;;  %93 = vset.pattern.permute.xlu1 %v126_v14  ;;  %v128_v34 = vmov 1   ;;  %s129_s13 = smov [#allocation2]   ;;  %s80_s1 = sshll.u32 %s159_s2, 4  ;;  %s81_s1 = int_to_ptr.hbm [resolvable:$true] %s80_s1 }
   0x4   :  { %94 = vset.pattern.permute.xlu2 %v128_v34  ;;  %95 = vset.pattern.permute.xlu0 %v128_v34  ;;  %s78_s14 = sshll.u32 %s129_s13, 4  ;;  %s79_s14 = int_to_ptr.vmem [resolvable:$true] %s78_s14 }
  0x76   :  { %v16_v2 = vpop.xlane.xlu0 %15 }
  0x77   :  { %v17_v3 = vmul.f32 0.0625, %v16_v2 }
  0x79   :  { %v18_v4 = vsub.f32 %v12_v0, %v17_v3 }
  0x7b   :  { %v19_v5 = vmul.f32 %v18_v4, %v18_v4 }
  0x7d   :  { %v20_v6 = vsel %vm13_vm0, %v19_v5, 0.0 }
  0x7e   :  { %21 = vadd.xlane.f32.xlu0 %v20_v6 }
  0xf1   :  { %v22_v7 = vpop.xlane.xlu0 %21 }
  0xf2   :  { %v23_v8 = vmul.f32 0.06666667, %v22_v7 }
  0xf4   :  { %96 = vrsqrt.f32 %v23_v8  ;;  %vm31_vm1 = vcmp.eq.f32.partialorder %v23_v8, inf  ;;  %v34_v17 = vand.u32 2147483648, %v23_v8  ;;  %vm33_vm2 = vcmp.eq.f32.partialorder %v23_v8, 0.0 }
  0xfa   :  { %v97_v9 = vpop.eup %96 }
  0xfb   :  { %v25_v10 = vmul.f32 %v97_v9, %v23_v8 }
  0xfd   :  { %v26_v11 = vmul.f32 %v97_v9, %v25_v10 }
  0xff   :  { %v27_v12 = vmul.f32 0.5, %v26_v11 }
 0x101   :  { %v28_v13 = vsub.f32 1.5, %v27_v12 }
 0x103   :  { %v29_v15 = vmul.f32 %v97_v9, %v28_v13 }
 0x105   :  { %v30_v16 = vmul.f32 %v29_v15, %v23_v8 }
 0x107   :  { %v32_v18 = vsel %vm31_vm1, %v23_v8, %v30_v16 }
 0x108   :  { %v35_v19 = vsel %vm33_vm2, %v34_v17, %v32_v18 }
 0x109   :  { %v36_v20 = vadd.f32 1e-05, %v35_v19 }
 0x10b   :  { %98 = vrcp.f32 %v36_v20  ;;  %v48_v24 = vand.u32 2147483648, %v36_v20  ;;  %v46_v26 = vand.u32 2147483647, %v36_v20  ;;  %vm42_vm4 = vweird.f32 %v36_v20 }
 0x10d   :  { %v49_v28 = vor.u32 1.1754944e-38, %v48_v24  ;;  %vm47_vm6 = vcmp.eq.f32.partialorder %v46_v26, 8.507059e+37 }
 0x111   :  { %v99_v21 = vpop.eup %98 }
 0x112   :  { %v38_v22 = vmul.f32 %v99_v21, %v36_v20  ;;  %vm43_vm3 = vweird.f32 %v99_v21 }
 0x113   :  { %vm44_vm5 = vmor %vm42_vm4, %vm43_vm3 }
 0x114   :  { %v39_v23 = vsub.f32 1.0, %v38_v22 }
 0x116   :  { %v40_v25 = vmul.f32 %v99_v21, %v39_v23 }
 0x118   :  { %v41_v27 = vadd.f32 %v99_v21, %v40_v25 }
 0x11a   :  { %v45_v30 = vsel %vm44_vm5, %v99_v21, %v41_v27 }
 0x11b   :  { %v50_v31 = vsel %vm47_vm6, %v49_v28, %v45_v30 }
 0x11c   :  { %v53_v32 = vmul.f32 %v52_v29, %v50_v31 }
 0x11e   :  { %v54_v33 = vmul.f32 %v53_v32, %v17_v3 }
 0x120   :  { %56 = vrot.lane.b32.xlu1 %v54_v33, %s127_s12 }
 0x128   :  { %62 = vperm.xlu1 %93, %v53_v32  }
 0x192   :  { %v57_v35 = vpop.permute.xlu1 %56 }
 0x193   :  { %v59_v36 = vsub.f32 %v52_v29, %v57_v35 }
 0x195   :  { %68 = vperm.xlu2 %94, %v59_v36  }
 0x19a   :  { %v63_v37 = vpop.permute.xlu1 %62 }
 0x19b   :  { %v65_v38 = vmul.f32 %v63_v37, %v12_v0 }
 0x1ef   :  { %v69_v39 = vpop.permute.xlu2 %68 }
 0x1f0   :  { %v71_v40 = vadd.f32 %v69_v39, %v65_v38 }
 0x1f2   :  { %72 = vst.msk [vmem:[#allocation2] sm:$0xff] %vm13_vm0, %v71_v40 }
 0x1f3   :  { %83 = dma.vmem_to_hbm [thread:$0]  %s79_s14, 128, %s81_s1, [#allocation3]  }
 0x1f4   :  { %124 = dma.done.wait [#allocation3], 128  }
 0x1f5   :  { %125 = vsyncadd [#allocation3], 4294967168 }
 0x1f6   :  { %88 = vsyncpa [#allocation3], 1 }

</bundles_post_ra>
